<compile_context>
chip_gen: v6e
topology: v6e:2x2x1
jax: 0.10.0
libtpu: 0.0.40
codegen_flags: <defaults>
</compile_context>

<pallas_src>
import jax
import jax.numpy as jnp
from jax.experimental import pallas as pl
from jax.experimental.pallas import tpu as pltpu


def _outconv_kernel(x_ref, w_ref, b_ref, o_ref):
    # x_ref: (bn, Cin, T)   w_ref: (Cout, Cin)   b_ref: (Cout, 1)
    # o_ref: (bn, Cout, T)
    w = w_ref[...]
    b = b_ref[...]
    bn = x_ref.shape[0]
    # bn is a small static constant -> static Python loop, one MXU dot each.
    for i in range(bn):
        acc = jnp.dot(w, x_ref[i], preferred_element_type=jnp.float32)
        o_ref[i] = (acc + b).astype(o_ref.dtype)


def outconv_pallas(x_nchw, weight, bias, *, target_step_bytes=4 * 1024 * 1024):
    """1x1 conv forward, NCHW in / NCHW out.

    x_nchw: (N, Cin, H, W)
    weight: (Cout, Cin, 1, 1)   -- PyTorch Conv2d weight layout
    bias:   (Cout,)
    returns (N, Cout, H, W)
    """
    N, Cin, H, W = x_nchw.shape
    Cout = weight.shape[0]
    HW = H * W
    itemsize = jnp.dtype(x_nchw.dtype).itemsize

    # Free views (no data movement): NCHW is already (N, Cin, HW)-contiguous.
    x3d = x_nchw.reshape(N, Cin, HW)
    w2d = weight.reshape(Cout, Cin)
    b2d = bias.reshape(Cout, 1)

    # ---- generation-aware VMEM budget -------------------------------------
    try:
        vmem_cap = int(pltpu.get_tpu_info().vmem_capacity_bytes)
    except Exception:
        vmem_cap = 64 * 1024 * 1024  # conservative fallback: fits every gen
    # Scoped limit: 3/4 of physical, capped at 100 MiB
    #   -> ~48 MiB on v7x (64 MiB physical), 96 MiB on v5e/v6e (128 MiB).
    vmem_limit = min(vmem_cap * 3 // 4, 100 * 1024 * 1024)
    # x-block and out-block are each double-buffered by the pipeline; keep one
    # (x + out) block pair to <= 1/3 of the scoped limit (2 in flight + slack).
    block_budget = vmem_limit // 3

    def pad8(c):  # sublane padding of the second-to-last dim (f32: 8)
        return max(8, -(-c // 8) * 8)

    # Bytes of (x + out) per HW element for a single image, sublane-padded.
    per_elem = (pad8(Cin) + pad8(Cout)) * itemsize

    # ---- lane-dense HW tile: biggest multiple of 128 that fits the budget --
    max_hw_tile = max(128, (block_budget // per_elem) // 128 * 128)
    if HW <= max_hw_tile:
        tile_hw, hw_tiles = HW, 1
    else:
        tile_hw, hw_tiles = max_hw_tile, pl.cdiv(HW, max_hw_tile)

    # ---- batch block: pack several whole images per step when they're small
    bn = 1
    if hw_tiles == 1:
        img_bytes = per_elem * HW
        for cand in range(2, N + 1):
            if N % cand != 0:
                continue
            if img_bytes * cand > block_budget:
                break
            if img_bytes * bn >= target_step_bytes:
                break
            bn = cand
    n_blocks = N // bn

    # v7x has 2 TensorCores: if everything collapsed into a single grid step
    # but each half would still be a "big" step, split HW in two so both cores
    # get work. (Tiny problems stay as one step — overhead would dominate.)
    if (n_blocks * hw_tiles == 1 and HW >= 256
            and per_elem * HW * bn >= 2 * target_step_bytes):
        tile_hw = max(128, (HW // 2) // 128 * 128)
        hw_tiles = pl.cdiv(HW, tile_hw)

    grid = (n_blocks, hw_tiles)

    cost = pl.CostEstimate(
        flops=2 * N * HW * Cin * Cout,
        transcendentals=0,
        bytes_accessed=itemsize * (N * HW * Cin + Cin * Cout + Cout + N * HW * Cout),
    )

    out3d = pl.pallas_call(
        _outconv_kernel,
        out_shape=jax.ShapeDtypeStruct((N, Cout, HW), x_nchw.dtype),
        grid_spec=pltpu.PrefetchScalarGridSpec(
            num_scalar_prefetch=0,
            grid=grid,
            in_specs=[
                # x: bn images, one HW tile per grid step (lane-dense last dim).
                pl.BlockSpec((bn, Cin, tile_hw), lambda n, j: (n, 0, j)),
                # weight / bias: tiny, resident across the whole grid.
                pl.BlockSpec((Cout, Cin), lambda n, j: (0, 0)),
                pl.BlockSpec((Cout, 1), lambda n, j: (0, 0)),
            ],
            out_specs=pl.BlockSpec((bn, Cout, tile_hw), lambda n, j: (n, 0, j)),
        ),
        compiler_params=pltpu.CompilerParams(
            # Every grid point is independent -> both axes parallel
            # (lets v7x shard across its 2 TensorCores; harmless on v5e/v6e).
            dimension_semantics=("parallel", "parallel"),
            vmem_limit_bytes=vmem_limit,
        ),
        cost_estimate=cost,
    )(x3d, w2d, b2d)

    return out3d.reshape(N, Cout, H, W)


if __name__ == "__main__":
    key = jax.random.PRNGKey(0)
    k_x, k_w, k_b = jax.random.split(key, 3)

    # Small shapes consistent with OutConv(in_channels=4, out_channels=3)
    N, Cin, H, W = 2, 4, 16, 16
    Cout = 3

    x = jax.random.normal(k_x, (N, Cin, H, W), dtype=jnp.float32)

    # Deterministic param init (mimics PyTorch Conv2d uniform(-1/sqrt(fan_in), ...))
    fan_in = Cin * 1 * 1
    bound = 1.0 / (fan_in ** 0.5)
    weight = jax.random.uniform(k_w, (Cout, Cin, 1, 1), jnp.float32, -bound, bound)
    bias = jax.random.uniform(k_b, (Cout,), jnp.float32, -bound, bound)

    out = outconv_pallas(x, weight, bias)
    jax.block_until_ready(out)

    # Sanity check against plain-JAX reference of the 1x1 conv.
    ref = (
        jnp.einsum("nchw,oc->nohw", x, weight.reshape(Cout, Cin))
        + bias[None, :, None, None]
    )
    assert out.shape == (N, Cout, H, W)
    assert jnp.allclose(out, ref, atol=1e-5, rtol=1e-5)

    print("KERNEL_OK")
</pallas_src>

<mosaic_0001>
module attributes {stable_mosaic.version = 11 : i64} {
  func.func @_outconv_kernel(%arg0: i32, %arg1: i32, %arg2: memref<2x4x256xf32, #tpu.memory_space<vmem>>, %arg3: memref<3x4xf32, #tpu.memory_space<vmem>>, %arg4: memref<3x1xf32, #tpu.memory_space<vmem>>, %arg5: memref<2x3x256xf32, #tpu.memory_space<vmem>>) attributes {dimension_semantics = [#tpu.dimension_semantics<parallel>, #tpu.dimension_semantics<parallel>], iteration_bounds = array<i64: 1, 1>, scalar_prefetch = 0 : i64, scratch_operands = 0 : i64, tpu.core_type = #tpu.core_type<tc>, window_params = [{transform_indices = @transform_0, window_bounds = array<i64: 2, 4, 256>}, {pipeline_mode = #tpu.pipeline_mode<synchronous>, transform_indices = @transform_1, window_bounds = array<i64: 3, 4>}, {pipeline_mode = #tpu.pipeline_mode<synchronous>, transform_indices = @transform_2, window_bounds = array<i64: 3, 1>}, {transform_indices = @transform_3, window_bounds = array<i64: 2, 3, 256>}]} {
    %c0 = arith.constant 0 : index
    %c0_0 = arith.constant 0 : index
    %0 = vector.load %arg3[%c0, %c0_0] : memref<3x4xf32, #tpu.memory_space<vmem>>, vector<3x4xf32>
    %c0_1 = arith.constant 0 : index
    %c0_2 = arith.constant 0 : index
    %1 = vector.load %arg4[%c0_1, %c0_2] : memref<3x1xf32, #tpu.memory_space<vmem>>, vector<3x1xf32>
    %c0_3 = arith.constant 0 : index
    %c0_4 = arith.constant 0 : index
    %c0_5 = arith.constant 0 : index
    %2 = vector.load %arg2[%c0_3, %c0_4, %c0_5] : memref<2x4x256xf32, #tpu.memory_space<vmem>>, vector<1x4x256xf32>
    %3 = vector.shape_cast %2 : vector<1x4x256xf32> to vector<4x256xf32>
    %cst = arith.constant dense<0.000000e+00> : vector<3x256xf32>
    %4 = tpu.matmul %0, %3, %cst {dimension_numbers = #tpu.dot_dimension_numbers<[1], [0], [0], [1], [0, 0, 1, 1], [], []>} : vector<3x4xf32>, vector<4x256xf32>, vector<3x256xf32> -> vector<3x256xf32>
    %5 = vector.broadcast %1 : vector<3x1xf32> to vector<3x256xf32>
    %6 = arith.addf %4, %5 : vector<3x256xf32>
    %c0_6 = arith.constant 0 : index
    %c0_7 = arith.constant 0 : index
    %c0_8 = arith.constant 0 : index
    %7 = vector.load %arg5[%c0_6, %c0_7, %c0_8] : memref<2x3x256xf32, #tpu.memory_space<vmem>>, vector<1x3x256xf32>
    %8 = vector.shape_cast %7 : vector<1x3x256xf32> to vector<3x256xf32>
    %9 = vector.shape_cast %6 : vector<3x256xf32> to vector<1x3x256xf32>
    tpu.vector_store %arg5[%c0_6, %c0_7, %c0_8], %9 {strides = array<i32>} : memref<2x3x256xf32, #tpu.memory_space<vmem>>, vector<1x3x256xf32>,
    %c1 = arith.constant 1 : index
    %c0_9 = arith.constant 0 : index
    %c0_10 = arith.constant 0 : index
    %10 = vector.load %arg2[%c1, %c0_9, %c0_10] : memref<2x4x256xf32, #tpu.memory_space<vmem>>, vector<1x4x256xf32>
    %11 = vector.shape_cast %10 : vector<1x4x256xf32> to vector<4x256xf32>
    %cst_11 = arith.constant dense<0.000000e+00> : vector<3x256xf32>
    %12 = tpu.matmul %0, %11, %cst_11 {dimension_numbers = #tpu.dot_dimension_numbers<[1], [0], [0], [1], [0, 0, 1, 1], [], []>} : vector<3x4xf32>, vector<4x256xf32>, vector<3x256xf32> -> vector<3x256xf32>
    %13 = vector.broadcast %1 : vector<3x1xf32> to vector<3x256xf32>
    %14 = arith.addf %12, %13 : vector<3x256xf32>
    %c1_12 = arith.constant 1 : index
    %c0_13 = arith.constant 0 : index
    %c0_14 = arith.constant 0 : index
    %15 = vector.load %arg5[%c1_12, %c0_13, %c0_14] : memref<2x3x256xf32, #tpu.memory_space<vmem>>, vector<1x3x256xf32>
    %16 = vector.shape_cast %15 : vector<1x3x256xf32> to vector<3x256xf32>
    %17 = vector.shape_cast %14 : vector<3x256xf32> to vector<1x3x256xf32>
    tpu.vector_store %arg5[%c1_12, %c0_13, %c0_14], %17 {strides = array<i32>} : memref<2x3x256xf32, #tpu.memory_space<vmem>>, vector<1x3x256xf32>,
    return
  }
  func.func @transform_0(%arg0: i32, %arg1: i32) -> (i32, i32, i32) {
    %c0_i32 = arith.constant 0 : i32
    %c0_i32_0 = arith.constant 0 : i32
    return %arg0, %c0_i32, %arg1 : i32, i32, i32
  }
  func.func @transform_1(%arg0: i32, %arg1: i32) -> (i32, i32) {
    %c0_i32 = arith.constant 0 : i32
    %c0_i32_0 = arith.constant 0 : i32
    %c0_i32_1 = arith.constant 0 : i32
    return %c0_i32, %c0_i32_0 : i32, i32
  }
  func.func @transform_2(%arg0: i32, %arg1: i32) -> (i32, i32) {
    %c0_i32 = arith.constant 0 : i32
    %c0_i32_0 = arith.constant 0 : i32
    %c0_i32_1 = arith.constant 0 : i32
    return %c0_i32, %c0_i32_0 : i32, i32
  }
  func.func @transform_3(%arg0: i32, %arg1: i32) -> (i32, i32, i32) {
    %c0_i32 = arith.constant 0 : i32
    %c0_i32_0 = arith.constant 0 : i32
    return %arg0, %c0_i32, %arg1 : i32, i32, i32
  }
}

</mosaic_0001>

<bundles_post_ra>
// kernel: tpu_custom_call.1
= control target key start
LH: loop header
LB: loop body
LE: loop exit
PB: predicated region body
PF: predicated region fallthrough
CT: control target
= control target key end

     0   :  { %8 = vsyncpa [#allocation3], 0  ;;  %s250_s12 = smov [#allocation2]   ;;  %s290_s0 = inlined_call_operand.hbm [shape: f32[2,4,256], index: 0, kind: input, shape index: {}]   ;;  %s291_s1 = inlined_call_operand.vmem [shape: f32[3,4], index: 1, kind: input, shape index: {}]   ;;  %s292_s2 = inlined_call_operand.vmem [shape: f32[3,1], index: 2, kind: input, shape index: {}]   ;;  %s293_s3 = inlined_call_operand.vmem [shape: f32[2,3,256], index: 3, kind: output, shape index: {}]  }
   0x1   :  { %s14_s13 = sshll.u32 %s250_s12, 4  ;;  %s15_s13 = int_to_ptr.vmem [resolvable:$true] %s14_s13 }
   0x2   :  { %s236_s14 = scalar_lea.vmem %s15_s13, 256  ;;  %p241_p1 = scmp.lt.s32.totalorder %s15_s13, %s15_s13 }
   0x3   :  { %p237_p0 = scmp.ne.s32.totalorder %s15_s13, %s236_s14  ;;  %p242_p2 = scmp.lt.s32.totalorder %s236_s14, %s236_s14 }
   0x5   :  { %p243_p3 = por %p242_p2, %p241_p1 }
   0x7   :  { %p244_p4 = pnand %p243_p3, %p237_p0 }
   0x9   :  { %247 = shalt.err (!%p244_p4)
}
   0xa   :  { %s251_s15 = smov 128   ;;  %s252_s16 = smov 8  }
   0xb   :  { %20 = dma.hbm_to_vmem [thread:$0]  %s290_s0, 256, %s15_s13, [#allocation3], %s251_s15, %s251_s15, %s252_s16  }
   0xc   :  { %248 = dma.done.wait [#allocation3], 256  }
   0xd   :  { %249 = vsyncadd [#allocation3], 4294967040  ;;  %v253_v0 = vmov 0.0   ;;  %v254_v1 = vmov 0   ;;  %v30_v2 = vld [vmem:[#allocation2] sm:$0xff]  ;;  %vm42_vm0 = vcmask 1043456  }
   0xe   :  { %111 = vmatprep.mubr.f32.mxu0 %v253_v0  ;;  %195 = vmatprep.mubr.f32.mxu1 %v253_v0  ;;  %v124_v3 = vld [vmem:[#allocation2 + $0x8] sm:$0xff]  ;;  %v37_v4 = vcombine.high %v30_v2, %v30_v2  ;;  %v29_v6 = vld [vmem:[%s292_s2] sm:$0x7]  ;;  %vm38_vm1 = vcmask 31744  }
   0xf   :  { %225 = vset.pattern.permute.xlu0 %v254_v1  ;;  %v126_v5 = vcombine.high %v124_v3, %v124_v3  ;;  %v28_v7 = vld [vmem:[%s291_s1] sm:$0x7] }
  0x10   :  { %33 = vperm.xlu0 %225, %v29_v6   ;;  %213 = vmatprep.subr.msk.mxu0 %vm42_vm0, %v37_v4 }
  0x11   :  { %216 = vmatprep.subr.msk.mxu1 %vm42_vm0, %v126_v5  ;;  %214 = vmatpush1.msk.msra.mxu0 %vm42_vm0, %v30_v2 }
  0x12   :  { %217 = vmatpush1.msk.msra.mxu1 %vm42_vm0, %v124_v3  ;;  %215 = vmatmul.mubr.msk.f32.vlgmr.msra.gmra.mxu0 %vm38_vm1, %v28_v7 }
  0x13   :  { %218 = vmatmul.mubr.msk.f32.vlgmr.msra.gmra.mxu1 %vm38_vm1, %v28_v7 }
  0x8b   :  { %v34_v8 = vpop.permute.xlu0 %33 }
  0xd2   :  { %v113_v9 = vpop.f32.mrf.mxu0 }
  0xd3   :  { %v197_v10 = vpop.f32.mrf.mxu1  ;;  %v114_v13 = vadd.f32 %v113_v9, %v34_v8 }
  0xd4   :  { %v115_v11 = vpop.f32.mrf.mxu0  ;;  %v198_v14 = vadd.f32 %v197_v10, %v34_v8 }
  0xd5   :  { %v199_v12 = vpop.f32.mrf.mxu1  ;;  %v116_v15 = vadd.f32 %v115_v11, %v34_v8 }
  0xd6   :  { %v200_v16 = vadd.f32 %v199_v12, %v34_v8 }
  0xd7   :  { %v120_v17 = vcombine.low %v114_v13, %v116_v15 }
  0xd8   :  { %v204_v18 = vcombine.low %v198_v14, %v200_v16 }
  0xd9   :  { %122 = vst [vmem:[%s293_s3] sm:$0x77] %v120_v17 }
  0xda   :  { %219 = vst [vmem:[%s293_s3 + $0x8] sm:$0x77] %v204_v18 }
  0xdb   :  { %212 = vsyncpa [#allocation3], 1 }

</bundles_post_ra>
